<compile_context>
chip_gen: v5e
topology: v5e:2x2
jax: 0.10.0
libtpu: 0.0.40
codegen_flags: <defaults>
</compile_context>

<pallas_src>
import math
import functools

import jax
import jax.numpy as jnp
from jax import lax
from jax.experimental import pallas as pl
from jax.experimental.pallas import tpu as pltpu


def _flash_attention_kernel(q_ref, k_ref, v_ref, o_ref,
                            m_sc, l_sc, acc_sc,
                            *, scale, mask_flag, tq, tk):
    # q_ref: (tq, E), k_ref: (tk, E), v_ref: (tk, D), o_ref: (tq, D)
    qi = pl.program_id(2)
    ki = pl.program_id(3)
    nk = pl.num_programs(3)

    @pl.when(ki == 0)
    def _init():
        m_sc[...] = jnp.full_like(m_sc, -jnp.inf)
        l_sc[...] = jnp.zeros_like(l_sc)
        acc_sc[...] = jnp.zeros_like(acc_sc)

    def _update():
        # Fold the softmax scale into q (commutes through the matmul; scale > 0
        # so the -inf mask is unaffected).
        q = q_ref[...] * scale                                     # (tq, E), native dtype
        k = k_ref[...]                                             # (tk, E)
        # 'qe,ke->qk' — contract E directly; MXU accumulates in f32.
        s = lax.dot_general(q, k, (((1,), (1,)), ((), ())),
                            preferred_element_type=jnp.float32)    # (tq, tk)

        if mask_flag:
            # TriangularCausalMask: mask where global col > global row.
            row = qi * tq + lax.broadcasted_iota(jnp.int32, (tq, tk), 0)
            col = ki * tk + lax.broadcasted_iota(jnp.int32, (tq, tk), 1)
            s = jnp.where(col > row, -jnp.inf, s)

        # Online softmax update.
        m_prev = m_sc[...]                                         # (tq, 1)
        m_new = jnp.maximum(m_prev, jnp.max(s, axis=-1, keepdims=True))
        alpha = jnp.exp(m_prev - m_new)
        p = jnp.exp(s - m_new)                                     # (tq, tk) f32
        l_sc[...] = alpha * l_sc[...] + jnp.sum(p, axis=-1, keepdims=True)
        acc_sc[...] = alpha * acc_sc[...] + jnp.dot(
            p.astype(v_ref.dtype), v_ref[...],
            preferred_element_type=jnp.float32)                    # (tq, D)
        m_sc[...] = m_new

    if mask_flag:
        # Skip kv tiles that lie entirely above the causal diagonal
        # (kv_start > q_end): no matmul, no exp, no accumulator update.
        pl.when(ki * tk <= qi * tq + (tq - 1))(_update)
    else:
        _update()

    @pl.when(ki == nk - 1)
    def _finalize():
        inv_l = pl.reciprocal(l_sc[...], approx=True)              # EUP vrcp
        o_ref[...] = (acc_sc[...] * inv_l).astype(o_ref.dtype)


def _pick_tile(dim, preferred):
    """Largest tile <= preferred that divides `dim` and is a multiple of 8
    (TPU second-minor constraint), falling back to the full dim."""
    if dim <= preferred:
        return dim
    for t in range(preferred, 0, -1):
        if dim % t == 0 and t % 8 == 0:
            return t
    return dim


def full_attention(queries, keys, values, *, scale=None, mask_flag=True,
                   block_q=128, block_k=256):
    """Pallas flash FullAttention forward.

    queries: [B, L, H, E], keys: [B, S, H, E], values: [B, S, H, D]
    Returns (output [B, L, H, D], None)   (output_attention=False).

    Tile-size guidance: block_q/block_k multiples of 128 (v5e MXU), 256-aligned
    and larger on v6e (128 MiB VMEM), more conservative on v7x (64 MiB VMEM).
    Defaults (128, 256) fit comfortably on all three generations.
    """
    B, L, H, E = queries.shape
    _, S, _, D = values.shape
    if scale is None:
        scale = 1.0 / math.sqrt(E)

    # Head-major layout for the kernel (standard flash-attention layout).
    q = jnp.transpose(queries, (0, 2, 1, 3))   # [B, H, L, E]
    k = jnp.transpose(keys,    (0, 2, 1, 3))   # [B, H, S, E]
    v = jnp.transpose(values,  (0, 2, 1, 3))   # [B, H, S, D]

    tq = _pick_tile(L, block_q)
    tk = _pick_tile(S, block_k)
    grid = (B, H, L // tq, S // tk)

    kernel = functools.partial(
        _flash_attention_kernel,
        scale=float(scale), mask_flag=bool(mask_flag), tq=tq, tk=tk)

    out_hm = pl.pallas_call(
        kernel,
        out_shape=jax.ShapeDtypeStruct((B, H, L, D), queries.dtype),
        grid_spec=pltpu.PrefetchScalarGridSpec(
            num_scalar_prefetch=0,
            grid=grid,
            in_specs=[
                pl.BlockSpec((None, None, tq, E), lambda b, h, qi, ki: (b, h, qi, 0)),
                pl.BlockSpec((None, None, tk, E), lambda b, h, qi, ki: (b, h, ki, 0)),
                pl.BlockSpec((None, None, tk, D), lambda b, h, qi, ki: (b, h, ki, 0)),
            ],
            out_specs=pl.BlockSpec((None, None, tq, D),
                                   lambda b, h, qi, ki: (b, h, qi, 0)),
            scratch_shapes=[
                pltpu.VMEM((tq, 1), jnp.float32),   # running max m
                pltpu.VMEM((tq, 1), jnp.float32),   # running denom l
                pltpu.VMEM((tq, D), jnp.float32),   # output accumulator
            ],
        ),
        compiler_params=pltpu.CompilerParams(
            dimension_semantics=("parallel", "parallel", "parallel", "arbitrary"),
            vmem_limit_bytes=32 * 1024 * 1024,
        ),
    )(q, k, v)

    output = jnp.transpose(out_hm, (0, 2, 1, 3))   # [B, L, H, D]
    return output, None


def _reference(queries, keys, values, scale=None, mask_flag=True):
    B, L, H, E = queries.shape
    S = keys.shape[1]
    scale = scale if scale is not None else 1.0 / math.sqrt(E)
    scores = jnp.einsum('blhe,bshe->bhls', queries, keys)
    if mask_flag:
        mask = jnp.triu(jnp.ones((L, S), dtype=bool), k=1)
        scores = jnp.where(mask[None, None], -jnp.inf, scores)
    attn = jax.nn.softmax(scale * scores, axis=-1)
    return jnp.einsum('bhls,bshd->blhd', attn, values)


if __name__ == "__main__":
    def _check(B, L, S, H, E, D, mask_flag, seed, **kw):
        kq, kk, kv = jax.random.split(jax.random.PRNGKey(seed), 3)
        queries = jax.random.normal(kq, (B, L, H, E), dtype=jnp.float32)
        keys = jax.random.normal(kk, (B, S, H, E), dtype=jnp.float32)
        values = jax.random.normal(kv, (B, S, H, D), dtype=jnp.float32)

        out, attn = full_attention(queries, keys, values,
                                   mask_flag=mask_flag, **kw)
        out = jax.block_until_ready(out)
        ref = _reference(queries, keys, values, mask_flag=mask_flag)

        assert out.shape == (B, L, H, D)
        assert attn is None
        # Tolerance 2e-3: approx reciprocal (EUP vrcp) + online-softmax
        # reordering vs the exact f32 reference.
        assert jnp.allclose(out, ref, atol=2e-3, rtol=2e-3), \
            f"mismatch vs reference (shape B={B} L={L} S={S} H={H} E={E} D={D})"

    # Small PyTorch-convention shapes: queries/keys/values are [B, seq, H, dim].
    _check(B=2, L=8, S=8, H=2, E=16, D=16, mask_flag=True, seed=0)
    # Multi-tile path: exercises online softmax across kv tiles + causal skipping.
    _check(B=1, L=512, S=512, H=2, E=64, D=64, mask_flag=True, seed=1,
           block_q=128, block_k=128)
    # Non-causal (cross-attention style) path.
    _check(B=2, L=8, S=16, H=2, E=16, D=16, mask_flag=False, seed=2)

    print("KERNEL_OK")
</pallas_src>

<mosaic_0001>
module attributes {stable_mosaic.version = 11 : i64} {
  func.func @_flash_attention_kernel(%arg0: i32, %arg1: i32, %arg2: i32, %arg3: i32, %arg4: memref<1x1x8x16xf32, #tpu.memory_space<vmem>>, %arg5: memref<1x1x8x16xf32, #tpu.memory_space<vmem>>, %arg6: memref<1x1x8x16xf32, #tpu.memory_space<vmem>>, %arg7: memref<1x1x8x16xf32, #tpu.memory_space<vmem>>, %arg8: memref<8x1xf32, #tpu.memory_space<vmem>>, %arg9: memref<8x1xf32, #tpu.memory_space<vmem>>, %arg10: memref<8x16xf32, #tpu.memory_space<vmem>>) attributes {dimension_semantics = [#tpu.dimension_semantics<parallel>, #tpu.dimension_semantics<parallel>, #tpu.dimension_semantics<parallel>, #tpu.dimension_semantics<arbitrary>], iteration_bounds = array<i64: 2, 2, 1, 1>, scalar_prefetch = 0 : i64, scratch_operands = 3 : i64, tpu.core_type = #tpu.core_type<tc>, window_params = [{transform_indices = @transform_0, window_bounds = array<i64: 1, 1, 8, 16>}, {transform_indices = @transform_1, window_bounds = array<i64: 1, 1, 8, 16>}, {transform_indices = @transform_2, window_bounds = array<i64: 1, 1, 8, 16>}, {transform_indices = @transform_3, window_bounds = array<i64: 1, 1, 8, 16>}]} {
    %c0_i32 = arith.constant 0 : i32
    %0 = arith.cmpi eq, %arg3, %c0_i32 : i32
    %1 = arith.extui %0 : i1 to i32
    %c0_i32_0 = arith.constant 0 : i32
    %2 = arith.cmpi ne, %1, %c0_i32_0 : i32
    scf.if %2 {
      %cst = arith.constant 0xFF800000 : f32
      %12 = vector.broadcast %cst : f32 to vector<8x1xf32>
      %c0 = arith.constant 0 : index
      %c0_5 = arith.constant 0 : index
      %13 = vector.load %arg8[%c0, %c0_5] : memref<8x1xf32, #tpu.memory_space<vmem>>, vector<8x1xf32>
      tpu.vector_store %arg8[%c0, %c0_5], %12 {strides = array<i32>} : memref<8x1xf32, #tpu.memory_space<vmem>>, vector<8x1xf32>,
      %cst_6 = arith.constant 0.000000e+00 : f32
      %14 = vector.broadcast %cst_6 : f32 to vector<8x1xf32>
      %c0_7 = arith.constant 0 : index
      %c0_8 = arith.constant 0 : index
      %15 = vector.load %arg9[%c0_7, %c0_8] : memref<8x1xf32, #tpu.memory_space<vmem>>, vector<8x1xf32>
      tpu.vector_store %arg9[%c0_7, %c0_8], %14 {strides = array<i32>} : memref<8x1xf32, #tpu.memory_space<vmem>>, vector<8x1xf32>,
      %cst_9 = arith.constant 0.000000e+00 : f32
      %16 = vector.broadcast %cst_9 : f32 to vector<8x16xf32>
      %c0_10 = arith.constant 0 : index
      %c0_11 = arith.constant 0 : index
      %17 = vector.load %arg10[%c0_10, %c0_11] : memref<8x16xf32, #tpu.memory_space<vmem>>, vector<8x16xf32>
      tpu.vector_store %arg10[%c0_10, %c0_11], %16 {strides = array<i32>} : memref<8x16xf32, #tpu.memory_space<vmem>>, vector<8x16xf32>,
    } else {
    }
    %c8_i32 = arith.constant 8 : i32
    %3 = arith.muli %arg3, %c8_i32 : i32
    %c8_i32_1 = arith.constant 8 : i32
    %4 = arith.muli %arg2, %c8_i32_1 : i32
    %c7_i32 = arith.constant 7 : i32
    %5 = arith.addi %4, %c7_i32 : i32
    %6 = arith.cmpi sle, %3, %5 : i32
    %7 = arith.extui %6 : i1 to i32
    %c0_i32_2 = arith.constant 0 : i32
    %8 = arith.cmpi ne, %7, %c0_i32_2 : i32
    scf.if %8 {
      %c0 = arith.constant 0 : index
      %c0_5 = arith.constant 0 : index
      %c0_6 = arith.constant 0 : index
      %c0_7 = arith.constant 0 : index
      %12 = vector.load %arg4[%c0, %c0_5, %c0_6, %c0_7] : memref<1x1x8x16xf32, #tpu.memory_space<vmem>>, vector<1x1x8x16xf32>
      %13 = vector.shape_cast %12 : vector<1x1x8x16xf32> to vector<8x16xf32>
      %cst = arith.constant 2.500000e-01 : f32
      %14 = vector.broadcast %cst : f32 to vector<8x16xf32>
      %15 = arith.mulf %13, %14 : vector<8x16xf32>
      %c0_8 = arith.constant 0 : index
      %c0_9 = arith.constant 0 : index
      %c0_10 = arith.constant 0 : index
      %c0_11 = arith.constant 0 : index
      %16 = vector.load %arg5[%c0_8, %c0_9, %c0_10, %c0_11] : memref<1x1x8x16xf32, #tpu.memory_space<vmem>>, vector<1x1x8x16xf32>
      %17 = vector.shape_cast %16 : vector<1x1x8x16xf32> to vector<8x16xf32>
      %cst_12 = arith.constant dense<0.000000e+00> : vector<8x8xf32>
      %18 = tpu.matmul %15, %17, %cst_12 {dimension_numbers = #tpu.dot_dimension_numbers<[1], [1], [0], [0], [0, 0, 1, 0], [], []>} : vector<8x16xf32>, vector<8x16xf32>, vector<8x8xf32> -> vector<8x8xf32>
      %c8_i32_13 = arith.constant 8 : i32
      %19 = arith.muli %arg2, %c8_i32_13 : i32
      %20 = tpu.iota {dimensions = array<i32: 0>} : vector<8x8xi32>
      %21 = vector.broadcast %19 : i32 to vector<8x8xi32>
      %22 = arith.addi %21, %20 : vector<8x8xi32>
      %c8_i32_14 = arith.constant 8 : i32
      %23 = arith.muli %arg3, %c8_i32_14 : i32
      %24 = tpu.iota {dimensions = array<i32: 1>} : vector<8x8xi32>
      %25 = vector.broadcast %23 : i32 to vector<8x8xi32>
      %26 = arith.addi %25, %24 : vector<8x8xi32>
      %27 = arith.cmpi sgt, %26, %22 : vector<8x8xi32>
      %cst_15 = arith.constant 0xFF800000 : f32
      %28 = vector.broadcast %cst_15 : f32 to vector<8x8xf32>
      %29 = arith.select %27, %28, %18 : vector<8x8xi1>, vector<8x8xf32>
      %c0_16 = arith.constant 0 : index
      %c0_17 = arith.constant 0 : index
      %30 = vector.load %arg8[%c0_16, %c0_17] : memref<8x1xf32, #tpu.memory_space<vmem>>, vector<8x1xf32>
      %cst_18 = arith.constant dense<0xFF800000> : vector<8xf32>
      %31 = vector.multi_reduction <maximumf>, %29, %cst_18 [1] : vector<8x8xf32> to vector<8xf32>
      %32 = vector.shape_cast %31 : vector<8xf32> to vector<8x1xf32>
      %33 = arith.maximumf %30, %32 : vector<8x1xf32>
      %34 = arith.subf %30, %33 : vector<8x1xf32>
      %35 = math.exp %34 : vector<8x1xf32>
      %36 = vector.broadcast %33 : vector<8x1xf32> to vector<8x8xf32>
      %37 = arith.subf %29, %36 : vector<8x8xf32>
      %38 = math.exp %37 : vector<8x8xf32>
      %c0_19 = arith.constant 0 : index
      %c0_20 = arith.constant 0 : index
      %39 = vector.load %arg9[%c0_19, %c0_20] : memref<8x1xf32, #tpu.memory_space<vmem>>, vector<8x1xf32>
      %40 = arith.mulf %35, %39 : vector<8x1xf32>
      %cst_21 = arith.constant dense<0.000000e+00> : vector<8xf32>
      %41 = vector.multi_reduction <add>, %38, %cst_21 [1] : vector<8x8xf32> to vector<8xf32>
      %42 = vector.shape_cast %41 : vector<8xf32> to vector<8x1xf32>
      %43 = arith.addf %40, %42 : vector<8x1xf32>
      %c0_22 = arith.constant 0 : index
      %c0_23 = arith.constant 0 : index
      %44 = vector.load %arg9[%c0_22, %c0_23] : memref<8x1xf32, #tpu.memory_space<vmem>>, vector<8x1xf32>
      tpu.vector_store %arg9[%c0_22, %c0_23], %43 {strides = array<i32>} : memref<8x1xf32, #tpu.memory_space<vmem>>, vector<8x1xf32>,
      %c0_24 = arith.constant 0 : index
      %c0_25 = arith.constant 0 : index
      %45 = vector.load %arg10[%c0_24, %c0_25] : memref<8x16xf32, #tpu.memory_space<vmem>>, vector<8x16xf32>
      %46 = vector.broadcast %35 : vector<8x1xf32> to vector<8x16xf32>
      %47 = arith.mulf %46, %45 : vector<8x16xf32>
      %c0_26 = arith.constant 0 : index
      %c0_27 = arith.constant 0 : index
      %c0_28 = arith.constant 0 : index
      %c0_29 = arith.constant 0 : index
      %48 = vector.load %arg6[%c0_26, %c0_27, %c0_28, %c0_29] : memref<1x1x8x16xf32, #tpu.memory_space<vmem>>, vector<1x1x8x16xf32>
      %49 = vector.shape_cast %48 : vector<1x1x8x16xf32> to vector<8x16xf32>
      %cst_30 = arith.constant dense<0.000000e+00> : vector<8x16xf32>
      %50 = tpu.matmul %38, %49, %cst_30 {dimension_numbers = #tpu.dot_dimension_numbers<[1], [0], [0], [1], [0, 0, 1, 1], [], []>} : vector<8x8xf32>, vector<8x16xf32>, vector<8x16xf32> -> vector<8x16xf32>
      %51 = arith.addf %47, %50 : vector<8x16xf32>
      %c0_31 = arith.constant 0 : index
      %c0_32 = arith.constant 0 : index
      %52 = vector.load %arg10[%c0_31, %c0_32] : memref<8x16xf32, #tpu.memory_space<vmem>>, vector<8x16xf32>
      tpu.vector_store %arg10[%c0_31, %c0_32], %51 {strides = array<i32>} : memref<8x16xf32, #tpu.memory_space<vmem>>, vector<8x16xf32>,
      %c0_33 = arith.constant 0 : index
      %c0_34 = arith.constant 0 : index
      %53 = vector.load %arg8[%c0_33, %c0_34] : memref<8x1xf32, #tpu.memory_space<vmem>>, vector<8x1xf32>
      tpu.vector_store %arg8[%c0_33, %c0_34], %33 {strides = array<i32>} : memref<8x1xf32, #tpu.memory_space<vmem>>, vector<8x1xf32>,
    } else {
    }
    %c0_i32_3 = arith.constant 0 : i32
    %9 = arith.cmpi eq, %arg3, %c0_i32_3 : i32
    %10 = arith.extui %9 : i1 to i32
    %c0_i32_4 = arith.constant 0 : i32
    %11 = arith.cmpi ne, %10, %c0_i32_4 : i32
    scf.if %11 {
      %c0 = arith.constant 0 : index
      %c0_5 = arith.constant 0 : index
      %12 = vector.load %arg9[%c0, %c0_5] : memref<8x1xf32, #tpu.memory_space<vmem>>, vector<8x1xf32>
      %13 = tpu.reciprocal %12 {approx = true} : vector<8x1xf32> -> vector<8x1xf32>
      %c0_6 = arith.constant 0 : index
      %c0_7 = arith.constant 0 : index
      %14 = vector.load %arg10[%c0_6, %c0_7] : memref<8x16xf32, #tpu.memory_space<vmem>>, vector<8x16xf32>
      %15 = vector.broadcast %13 : vector<8x1xf32> to vector<8x16xf32>
      %16 = arith.mulf %14, %15 : vector<8x16xf32>
      %c0_8 = arith.constant 0 : index
      %c0_9 = arith.constant 0 : index
      %c0_10 = arith.constant 0 : index
      %c0_11 = arith.constant 0 : index
      %17 = vector.load %arg7[%c0_8, %c0_9, %c0_10, %c0_11] : memref<1x1x8x16xf32, #tpu.memory_space<vmem>>, vector<1x1x8x16xf32>
      %18 = vector.shape_cast %17 : vector<1x1x8x16xf32> to vector<8x16xf32>
      %19 = vector.shape_cast %16 : vector<8x16xf32> to vector<1x1x8x16xf32>
      tpu.vector_store %arg7[%c0_8, %c0_9, %c0_10, %c0_11], %19 {strides = array<i32>} : memref<1x1x8x16xf32, #tpu.memory_space<vmem>>, vector<1x1x8x16xf32>,
    } else {
    }
    return
  }
  func.func @transform_0(%arg0: i32, %arg1: i32, %arg2: i32, %arg3: i32) -> (i32, i32, i32, i32) {
    %c0_i32 = arith.constant 0 : i32
    %c0_i32_0 = arith.constant 0 : i32
    return %arg0, %arg1, %arg2, %c0_i32 : i32, i32, i32, i32
  }
  func.func @transform_1(%arg0: i32, %arg1: i32, %arg2: i32, %arg3: i32) -> (i32, i32, i32, i32) {
    %c0_i32 = arith.constant 0 : i32
    %c0_i32_0 = arith.constant 0 : i32
    return %arg0, %arg1, %arg3, %c0_i32 : i32, i32, i32, i32
  }
  func.func @transform_2(%arg0: i32, %arg1: i32, %arg2: i32, %arg3: i32) -> (i32, i32, i32, i32) {
    %c0_i32 = arith.constant 0 : i32
    %c0_i32_0 = arith.constant 0 : i32
    return %arg0, %arg1, %arg3, %c0_i32 : i32, i32, i32, i32
  }
  func.func @transform_3(%arg0: i32, %arg1: i32, %arg2: i32, %arg3: i32) -> (i32, i32, i32, i32) {
    %c0_i32 = arith.constant 0 : i32
    %c0_i32_0 = arith.constant 0 : i32
    return %arg0, %arg1, %arg2, %c0_i32 : i32, i32, i32, i32
  }
}

</mosaic_0001>

<bundles_post_ra>
// kernel: tpu_custom_call.1
= control target key start
LH: loop header
LB: loop body
LE: loop exit
PB: predicated region body
PF: predicated region fallthrough
CT: control target
= control target key end

     0   :  { %s1139_s0 = inlined_call_operand.hbm [shape: f32[2,2,8,16], index: 0, kind: input, shape index: {}]   ;;  %s1140_s1 = inlined_call_operand.hbm [shape: f32[2,2,8,16], index: 1, kind: input, shape index: {}]   ;;  %s1141_s2 = inlined_call_operand.hbm [shape: f32[2,2,8,16], index: 2, kind: input, shape index: {}]   ;;  %s1142_s3 = inlined_call_operand.hbm [shape: f32[2,2,8,16], index: 3, kind: output, shape index: {}]  }
   0x1   :  { %1148 = sst [smem:[#allocation21_spill]] %s1140_s1 }
   0x2   :  { %8 = vsyncpa [#allocation6], 0 }
   0x3   :  { %10 = vsyncpa [#allocation6 + $0x1], 0 }
   0x4   :  { %11 = vsyncpa [#allocation9], 0 }
   0x5   :  { %13 = vsyncpa [#allocation9 + $0x1], 0 }
   0x6   :  { %14 = vsyncpa [#allocation7], 0 }
   0x7   :  { %16 = vsyncpa [#allocation7 + $0x1], 0  ;;  %s947_s12 = smov 0   ;;  %s949_s13 = smov 0  }
   0x8   :  { %s951_s14 = smov 0   ;;  %s953_s15 = smov 0  }
   0x9   :  { %s955_s16 = smov 0   ;;  %s957_s17 = smov 0  }
   0xa   :  { %s959_s18 = smov 0   ;;  %s961_s19 = smov 0  }
   0xb LB: > { %1149 = sst [smem:[#allocation15_spill]] %s902_s14  ;;  %s988_s20 = sadd.s32 4294967295, %s922_s19   ;;  %s922_s19 = sphi %s961_s19, %s22_s19   ;;  %s918_s18 = sphi %s959_s18, %s1167_s18   ;;  %s914_s17 = sphi %s957_s17, %s1171_s17   ;;  %s910_s16 = sphi %s955_s16, %s1165_s16   ;;  %s906_s15 = sphi %s953_s15, %s1164_s15   ;;  %s902_s14 = sphi %s951_s14, %s1170_s14   ;;  %s898_s13 = sphi %s949_s13, %s1169_s13   ;;  %s894_s12 = sphi %s947_s12, %s1168_s12  }
   0xc   : > { %1150 = sst [smem:[#allocation16_spill]] %s914_s17  ;;  %s605_s21 = sadd.s32 4294967294, %s922_s19  }
   0xd   : > { %1151 = sst [smem:[#allocation17_spill]] %s918_s18  ;;  %s44_s22 = sadd.s32 1, %s914_s17 }
   0xe   : > { %s48_s23 = sadd.s32 1, %s918_s18  ;;  %p46_p0 = scmp.ge.s32.totalorder %s44_s22, 2 }
   0xf   : > { %s59_s24 = sadd.s32 1, %s902_s14  ;;  %p66_p1 = scmp.ne.s32.totalorder %s902_s14, %s898_s13 }
  0x10   : > { %p67_p2 = scmp.eq.s32.totalorder %s922_s19, 0  ;;  %s1173_s22 = smov (%p46_p0, %s44_s22), 0 }
  0x11   : > { %1152 = sst [smem:[#allocation18_spill]] %s1173_s22  ;;  %s1175_s23 = smov (!%p46_p0, %s48_s23), %s918_s18 }
  0x12   : > { %s53_s25 = ssub.s32 %s914_s17, %s1173_s22  ;;  %p1002_p3 = por %p67_p2, %p66_p1 }
  0x13   : > { %p50_p4 = scmp.ge.s32.totalorder %s1175_s23, 2  ;;  %p72_p5 = scmp.ne.s32.totalorder %s898_s13, %s894_s12 }
  0x14   : > { %p73_p6 = scmp.eq.s32.totalorder %s988_s20, 0  ;;  %p160_p7 = scmp.eq.s32.totalorder %s988_s20, 3 }
  0x15   : > { %s1177_s23 = smov (%p50_p4, %s1175_s23), 0  ;;  %p166_p10 = scmp.eq.s32.totalorder %s605_s21, 3 }
  0x16   : > { %1154 = sst [smem:[#allocation19_spill]] %s1177_s23  ;;  %p1012_p8 = por %p73_p6, %p72_p5 }
  0x17   : > { %p1016_p9 = por %p160_p7, %p66_p1  ;;  %s52_s29 = ssub.s32 %s918_s18, %s1177_s23 }
  0x18   : > { %s54_s30 = sor.u32 %s53_s25, %s52_s29  ;;  %p1022_p12 = por %p166_p10, %p72_p5 }
  0x19   : > { %p57_p11 = scmp.eq.s32.totalorder %s54_s30, 0  ;;  %p652_p13 = scmp.lt.s32.totalorder %s922_s19, 4 }
  0x1a   : > { %s186_s5 = sand.u32 1, %s902_s14   ;;  %s609_s8 = sshll.u32 %s918_s18, 1 }
  0x1b   : > { %s1029_s6 = scalar_select %p57_p11, %s902_s14, %s59_s24  }
  0x1c   : > { %s608_s7 = sshll.u32 %s186_s5, 3  ;;  %s195_s9 = sadd.s32 %s914_s17, %s609_s8 }
  0x1d   : > { %1158 = sst [smem:[#allocation20_spill]] %s1029_s6  ;;  %p1035_p0 = pnand %p652_p13, %p1002_p3 }
  0x1e   : > { %s610_s11 = sshll.u32 %s195_s9, 3  ;;  %s208_s21 = sand.u32 1, %s922_s19  }
  0x1f   : > { %s1160_s1 = sld [smem:[#allocation21_spill]]  ;;  %s212_s22 = scalar_lea.vmem [#allocation8], %s608_s7 }
  0x20   : > { %s223_s24 = sshll.u32 %s212_s22, 4  ;;  %s209_s18 = scalar_lea.sflag [#allocation9], %s208_s21  ;;  %s224_s24 = int_to_ptr.vmem [resolvable:$true] %s223_s24 }
  0x21   : > { %p617_p1 = scmp.ge.s32.totalorder %s922_s19, 1  ;;  %p250_p2 = scmp.lt.s32.totalorder %s922_s19, 5 }
  0x22   : > { %s197_s25 = scalar_lea.hbm %s1139_s0, %s610_s11  ;;  %s187_s22 = scalar_lea.sflag [#allocation6], %s186_s5 }
  0x23   : > { %p1047_p3 = pnand %p617_p1, %p250_p2  ;;  %s199_s29 = sshll.u32 %s197_s25, 4  ;;  %s200_s29 = int_to_ptr.hbm [resolvable:$true] %s199_s29 }
  0x24   : > { %s234_s6 = scalar_lea.vmem [#allocation10], %s608_s7  ;;  %s1064_s8 = sand.u32 (!%p1047_p3), 1, %s898_s13  }
  0x25   : > { %s219_s30 = scalar_lea.hbm %s1160_s1, %s610_s11  ;;  %s245_s14 = sshll.u32 %s234_s6, 4  ;;  %s246_s14 = int_to_ptr.vmem [resolvable:$true] %s245_s14 }
  0x26   : > { %s221_s23 = sshll.u32 %s219_s30, 4  ;;  %s190_s30 = scalar_lea.vmem [#allocation5], %s608_s7  ;;  %s222_s23 = int_to_ptr.hbm [resolvable:$true] %s221_s23 }
  0x27   : > { %644 = dma.hbm_to_vmem [thread:$0]  (!%p1035_p0), %s222_s23, 128, %s224_s24, %s209_s18  }
  0x28   : > { %s201_s1 = sshll.u32 %s190_s30, 4  ;;  %s241_s24 = scalar_lea.hbm %s1141_s2, %s610_s11  ;;  %s202_s1 = int_to_ptr.vmem [resolvable:$true] %s201_s1 }
  0x29   : > { %641 = dma.hbm_to_vmem [thread:$0]  (!%p1035_p0), %s200_s29, 128, %s202_s1, %s187_s22  }
  0x2a   : > { %s243_s17 = sshll.u32 %s241_s24, 4  ;;  %254 = sbr.rel (%p1047_p3) target bundleno = 657 (0x291), region = 32  ;;  %s244_s17 = int_to_ptr.hbm [resolvable:$true] %s243_s17 }
  0x2b   : > { %647 = dma.hbm_to_vmem [thread:$0]  (!%p1035_p0), %s244_s17, 128, %s246_s14, %s209_s18  }
  0x2c   : > { %s1067_s1 = sshll.u32 (!%p1047_p3), %s1064_s8, 3  ;;  %s257_s5 = scalar_lea.sflag (!%p1047_p3), [#allocation6], %s1064_s8 }
  0x2d   : > { %s260_s11 = scalar_lea.vmem (!%p1047_p3), [#allocation5], %s1067_s1 }
  0x2f   : > { %881 = dma.done.wait (%p1012_p8), %s257_s5, 128  }
  0x30   : > { %883 = vsyncadd (%p1012_p8), %s257_s5, 4294967168  ;;  %s266_s14 = sand.u32 1, %s988_s20   ;;  %s270_s18 = scalar_lea.vmem [#allocation8], %s1067_s1 }
  0x31   : > { %s267_s17 = scalar_lea.sflag [#allocation9], %s266_s14 }
  0x32   : > { %885 = dma.done.wait (%p1012_p8), %s267_s17, 256  }
  0x33   : > { %887 = vsyncadd (%p1012_p8), %s267_s17, 4294967040  ;;  %vm321_vm0 = vcmask 130048   ;;  %v924_v0 = vmov 0.0   ;;  %v332_v1 = vld [vmem:[%s270_s18] sm:$0xff]  ;;  %v330_v2 = vld [vmem:[%s260_s11] sm:$0xff]  ;;  %vm318_vm1 = vcmask 7168   ;;  %v360_v5 = vlaneseq }
  0x34   : > { %322 = vst.msk [vmem:[#allocation4] sm:$0xff] %vm321_vm0, %v924_v0  ;;  %622 = vmatpush.xpose.msk.msra.mxu0 %vm321_vm0, %v332_v1  ;;  %v331_v3 = vmul.f32 0.25, %v330_v2  ;;  %v925_v4 = vmov -inf   ;;  %vm371_vm3 = vcmask 64512   ;;  %v926_v11 = vmov 0   ;;  %s280_s20 = scalar_lea.vmem [#allocation10], %s1067_s1 }
  0x35   : > { %319 = vst.msk [vmem:[#allocation2] sm:$0xff] %vm318_vm1, %v925_v4  ;;  %v361_v6 = vshrl.u32 %v360_v5, 7  ;;  %v365_v7 = vand.u32 127, %v360_v5  ;;  %721 = vset.pattern.permute.xlu0 %v926_v11  ;;  %722 = vset.pattern.permute.xlu1 %v926_v11  ;;  %v402_v16 = vld [vmem:[%s280_s20] sm:$0xff]  ;;  %s626_s27 = sshll.u32 %s910_s16, 1  ;;  %s313_s25 = scalar_lea.vmem [#allocation11], %s1067_s1 }
  0x36   : > { %320 = vst.msk [vmem:[#allocation3] sm:$0xff] %vm318_vm1, %v924_v0  ;;  %723 = vset.pattern.permute.xlu2 %v926_v11  ;;  %421 = vmatpush.msra.mxu1 %v402_v16  ;;  %s455_s6 = sadd.s32 %s906_s15, %s626_s27  ;;  %s459_s29 = sshll.u32 %s313_s25, 4  ;;  %s460_s29 = int_to_ptr.vmem [resolvable:$true] %s459_s29 }
  0x37   : > { %623 = vmatmul.msk.f32.vlgmr.msra.gmra.mxu0 %vm321_vm0, %v331_v3  ;;  %vm368_vm2 = vcmp.gt.s32.totalorder %v365_v7, %v361_v6  ;;  %s627_s7 = sshll.u32 %s455_s6, 3  ;;  %s444_s22 = scalar_lea.sflag [#allocation7], %s1064_s8 }
  0x38   : > { %s457_s9 = scalar_lea.hbm %s1142_s3, %s627_s7  ;;  %s840_s24 = scalar_lea.hbm %s1142_s3, 32 }
  0x39   : > { %s461_s30 = sshll.u32 %s457_s9, 4  ;;  %s462_s30 = int_to_ptr.hbm [resolvable:$true] %s461_s30 }
  0x3a   : > { %s834_s23 = sshra.s32 %s462_s30, 4  ;;  %s835_s23 = int_to_ptr.hbm [resolvable:$true] %s834_s23 }
  0x3b   : > { %v395_v30 = vld [vmem:[#allocation4] sm:$0xff]  ;;  %s836_s15 = scalar_lea.hbm %s835_s23, 8  ;;  %p841_p7 = scmp.lt.s32.totalorder %s835_s23, %s1142_s3 }
  0x3c   : > { %v370_v12 = vld [vmem:[#allocation2] sm:$0xff]  ;;  %p837_p4 = scmp.ne.s32.totalorder %s835_s23, %s836_s15  ;;  %p842_p8 = scmp.lt.s32.totalorder %s840_s24, %s836_s15 }
  0x3d   : > { %v387_v24 = vld [vmem:[#allocation3] sm:$0xff] }
  0x3e   : > { %p838_p5 = pnand %p837_p4, %p1016_p9  ;;  %p843_p10 = por %p842_p8, %p841_p7 }
  0x40   : > { %p839_p6 = pneg %p838_p5 }
  0x42   : > { %p844_p11 = pnand %p843_p10, %p839_p6 }
  0xb4   : > { %v357_v8 = vpop.f32.mrf.mxu0 }
  0xb5   : > { %v369_v9 = vsel %vm368_vm2, -inf, %v357_v8 }
  0xb6   : > { %v372_v10 = vsel %vm371_vm3, %v369_v9, -inf }
  0xb7   : > { %373 = vmax.xlane.f32.xlu0 %v372_v10 }
 0x12a   : > { %v374_v13 = vpop.xlane.xlu0 %373 }
 0x12b   : > { %v375_v14 = vmax.f32 %v370_v12, %v374_v13 }
 0x12d   : > { %v376_v15 = vsub.f32 %v370_v12, %v375_v14  ;;  %428 = vst.msk [vmem:[#allocation2] sm:$0xff] %vm318_vm1, %v375_v14  ;;  %381 = vperm.xlu0 %721, %v375_v14  }
 0x12f   : > { %v377_v22 = vmul.f32 1.442695, %v376_v15 }
 0x19f   : > { %v382_v17 = vpop.permute.xlu0 %381 }
 0x1a0   : > { %v384_v18 = vsub.f32 %v369_v9, %v382_v17 }
 0x1a2   : > { %v385_v19 = vmul.f32 1.442695, %v384_v18 }
 0x1a4   : > { %724 = vpow2.f32 %v385_v19 }
 0x1a5   : > { %726 = vpow2.f32 %v377_v22 }
 0x1aa   : > { %v725_v20 = vpop.eup %724 }
 0x1ab   : > { %624 = vmatmul.msk.f32.vlgmr.msra.gmra.mxu1 %vm371_vm3, %v725_v20  ;;  %v389_v21 = vsel %vm371_vm3, %v725_v20, 0.0  ;;  %v727_v23 = vpop.eup %726 }
 0x1ac   : > { %390 = vadd.xlane.f32.xlu1 %v389_v21  ;;  %v388_v25 = vmul.f32 %v727_v23, %v387_v24 }
 0x1c5   : > { %398 = vperm.xlu1 %722, %v727_v23  }
 0x21f   : > { %v391_v26 = vpop.xlane.xlu1 %390 }
 0x220   : > { %v392_v27 = vadd.f32 %v391_v26, %v388_v25 }
 0x222   : > { %394 = vst.msk [vmem:[#allocation3] sm:$0xff] %vm318_vm1, %v392_v27 }
 0x228   : > { %v423_v33 = vpop.f32.mrf.mxu1 }
 0x229   : > { %v432_v28 = vld [vmem:[#allocation3] sm:$0xff] }
 0x22a   : > { %728 = vrcp.f32 %v432_v28 }
 0x230   : > { %v729_v29 = vpop.eup %728 }
 0x231   : > { %437 = vperm.xlu2 %723, %v729_v29  }
 0x237   : > { %v399_v31 = vpop.permute.xlu1 %398 }
 0x238   : > { %v401_v32 = vmul.f32 %v399_v31, %v395_v30 }
 0x23a   : > { %v426_v34 = vadd.f32 %v423_v33, %v401_v32 }
 0x23c   : > { %427 = vst.msk [vmem:[#allocation4] sm:$0xff] %vm321_vm0, %v426_v34 }
 0x243   : > { %v434_v35 = vld [vmem:[#allocation4] sm:$0xff] }
 0x28b   : > { %v438_v36 = vpop.permute.xlu2 %437 }
 0x28c   : > { %v440_v37 = vmul.f32 %v438_v36, %v434_v35 }
 0x28e   : > { %442 = vst.msk [vmem:[%s313_s25] sm:$0xff] %vm321_vm0, %v440_v37 }
 0x28f   : > { %847 = shalt.err (!%p844_p11)
}
 0x290   : > { %636 = dma.vmem_to_hbm [thread:$0]  (%p1016_p9), %s460_s29, 128, %s462_s30, %s444_s22  }
 0x291 PF: > { %p653_p13 = scmp.ge.s32.totalorder %s922_s19, 2  ;;  %s473_s8 = sand.u32 1, %s894_s12  }
 0x292   : > { %s474_s11 = scalar_lea.sflag [#allocation7], %s473_s8 }
 0x293   : > { %p649_p0 = pnand %p653_p13, %p1022_p12 }
 0x295   : > { %p650_p1 = pneg %p649_p0 }
 0x297   : > { %889 = dma.done.wait (%p650_p1), %s474_s11, 128  }
 0x298   : > { %891 = vsyncadd (%p650_p1), %s474_s11, 4294967168  ;;  %s22_s19 = sadd.s32 1, %s922_s19   ;;  %s1162_s14 = sld [smem:[#allocation15_spill]] }
 0x299   : > { %p19_p2 = scmp.ge.s32.totalorder %s22_s19, 6   ;;  %s1163_s17 = sld [smem:[#allocation20_spill]] }
 0x29a   : > { %s1164_s15 = sld [smem:[#allocation16_spill]]  ;;  %s1168_s12 = smov %s898_s13 }
 0x29b   : > { %s1165_s16 = sld [smem:[#allocation17_spill]] }
 0x29c   : > { %s1166_s28 = sld [smem:[#allocation18_spill]] }
 0x29d   : > { %s1167_s18 = sld [smem:[#allocation19_spill]] }
 0x29e   : > { %s1169_s13 = smov %s1162_s14  ;;  %21 = sbr.rel (!%p19_p2) target bundleno = 11 (0xb), region = 113 }
 0x29f   : > { %s1170_s14 = smov %s1163_s17 }
 0x2a2   : > { %s1171_s17 = smov %s1166_s28 }
 0x2a3   :  { %480 = vsyncpa [#allocation6], 1 }
 0x2a4   :  { %482 = vsyncpa [#allocation6 + $0x1], 1 }
 0x2a5   :  { %483 = vsyncpa [#allocation9], 1 }
 0x2a6   :  { %485 = vsyncpa [#allocation9 + $0x1], 1 }
 0x2a7   :  { %486 = vsyncpa [#allocation7], 1 }
 0x2a8   :  { %488 = vsyncpa [#allocation7 + $0x1], 1 }

</bundles_post_ra>
